<compile_context>
chip_gen: v7x
topology: tpu7x:2x2x1
jax: 0.10.0
libtpu: 0.0.40
codegen_flags: <defaults>
</compile_context>

<pallas_src>
import jax
import jax.numpy as jnp
from jax.experimental import pallas as pl
from jax.experimental.pallas import tpu as pltpu

# (in_features, out_features) of each PyTorch Linear, in forward order.
LAYER_DIMS = [(4, 8), (8, 16), (16, 32), (32, 32), (32, 64), (64, 50)]
N_LAYERS = len(LAYER_DIMS)
PAD_F = 64                     # padded feature width (lane-dense)
IN0 = LAYER_DIMS[0][0]         # 4 real input features
IN0_PAD = 8                    # input padded to a full sublane group
OUT_REAL = LAYER_DIMS[-1][1]   # 50 real output features


# ---------------------------------------------------------------------------
# Fused MLP kernel: six Linear layers + interleaved ReLUs in one body.
# x_ref: (TILE_B, 8)   w_ref: (6, 64, 64)   b_ref: (8, 64)   o_ref: (TILE_B, 64)
# ---------------------------------------------------------------------------
def mlp_kernel(x_ref, w_ref, b_ref, o_ref):
    # Layer 0: input is zero-padded to 8 features, so contract against the
    # sublane-aligned 8-row block of the padded weight slab (rows 4..7 are 0).
    # (precision=HIGHEST could be added for bit-parity with CPU fp32; the
    #  default matches the plain-JAX reference and is plenty accurate here.)
    h = jnp.dot(x_ref[...], w_ref[0, :IN0_PAD, :],
                preferred_element_type=jnp.float32)
    h = jnp.maximum(h + b_ref[0:1, :], 0.0)

    # Layers 1..5: everything is 64-wide and zero-padded, stays lane-dense.
    for l in range(1, N_LAYERS):
        h = jnp.dot(h, w_ref[l], preferred_element_type=jnp.float32)
        h = h + b_ref[l:l + 1, :]
        if l < N_LAYERS - 1:                                  # no ReLU after l7
            h = jnp.maximum(h, 0.0)

    o_ref[...] = h.astype(o_ref.dtype)


def mlp_forward(x, w_slab, b_slab, *, tile_b_max=4096,
                out_dtype=jnp.float32, slice_output=True):
    """x: (B, 4) float32.  w_slab: (6, 64, 64).  b_slab: (8, 64).

    Returns (B, 50) by default.  Set slice_output=False to get the padded
    (b_pad, 64) buffer (lets a consumer fuse the slice away), and
    out_dtype=jnp.bfloat16 to halve HBM writeback if downstream tolerates it.
    """
    B = x.shape[0]

    # --- batch tile selection -------------------------------------------------
    # Enough steps to cover the batch at tile_b_max, and >=2 steps when the
    # batch allows it so v7x's second TensorCore gets work ("parallel" axis).
    n_steps = pl.cdiv(B, tile_b_max)
    if B >= 16:
        n_steps = max(n_steps, 2)
    tile_b = ((pl.cdiv(B, n_steps) + 7) // 8) * 8     # round up to 8 sublanes
    b_pad = tile_b * n_steps                          # == B when B % 8 == 0

    # Pad rows up to b_pad and features 4 -> 8 (zeros are inert through the MLP).
    x = jnp.pad(x, ((0, b_pad - B), (0, IN0_PAD - IN0)))

    out = pl.pallas_call(
        mlp_kernel,
        out_shape=jax.ShapeDtypeStruct((b_pad, PAD_F), out_dtype),
        grid=(n_steps,),
        in_specs=[
            pl.BlockSpec((tile_b, IN0_PAD), lambda i: (i, 0)),    # x tile
            pl.BlockSpec(w_slab.shape, lambda i: (0, 0, 0)),      # weights: resident
            pl.BlockSpec(b_slab.shape, lambda i: (0, 0)),         # biases:  resident
        ],
        out_specs=pl.BlockSpec((tile_b, PAD_F), lambda i: (i, 0)),
        compiler_params=pltpu.CompilerParams(
            dimension_semantics=("parallel",),        # megacore sharding on v7x
            vmem_limit_bytes=32 * 1024 * 1024),       # headroom for big tiles (v5e)
    )(x, w_slab, b_slab)

    if not slice_output:
        return out                                   # (b_pad, 64) padded result
    if b_pad != B:
        out = out[:B]                                # only when B % 8 != 0
    return out[:, :OUT_REAL]


# ---------------------------------------------------------------------------
# Parameter construction / packing
# ---------------------------------------------------------------------------
def init_params(key):
    """PyTorch-style init; weights stored as (in, out) so the kernel does x @ W."""
    weights, biases = [], []
    for fan_in, fan_out in LAYER_DIMS:
        kw, kb, key = jax.random.split(key, 3)
        bound = 1.0 / (fan_in ** 0.5)
        weights.append(
            jax.random.uniform(kw, (fan_in, fan_out), jnp.float32, -bound, bound))
        biases.append(
            jax.random.uniform(kb, (fan_out,), jnp.float32, -bound, bound))
    return weights, biases


def pack_params(weights, biases):
    """Zero-pad and stack per-layer params into two lane/sublane-aligned slabs."""
    w_slab = jnp.zeros((N_LAYERS, PAD_F, PAD_F), jnp.float32)
    b_slab = jnp.zeros((8, PAD_F), jnp.float32)          # 6 used rows, padded to 8
    for l, ((fi, fo), w, b) in enumerate(zip(LAYER_DIMS, weights, biases)):
        w_slab = w_slab.at[l, :fi, :fo].set(w.astype(jnp.float32))
        b_slab = b_slab.at[l, :fo].set(b.astype(jnp.float32))
    return w_slab, b_slab


if __name__ == "__main__":
    key = jax.random.PRNGKey(0)
    k_x, k_p = jax.random.split(key)

    batch = 8
    x = jax.random.normal(k_x, (batch, IN0), dtype=jnp.float32)
    weights, biases = init_params(k_p)
    w_slab, b_slab = pack_params(weights, biases)

    out = mlp_forward(x, w_slab, b_slab)
    jax.block_until_ready(out)
    assert out.shape == (batch, OUT_REAL), out.shape

    # Reference check in plain JAX (same math as the PyTorch module).
    ref = x
    for l, (w, b) in enumerate(zip(weights, biases)):
        ref = ref @ w + b
        if l < N_LAYERS - 1:
            ref = jnp.maximum(ref, 0.0)
    assert jnp.allclose(out, ref, atol=1e-5, rtol=1e-5)

    print("KERNEL_OK")
</pallas_src>

<mosaic_0001>
module attributes {stable_mosaic.version = 11 : i64} {
  func.func @mlp_kernel(%arg0: i32, %arg1: memref<8x8xf32, #tpu.memory_space<vmem>>, %arg2: memref<6x64x64xf32, #tpu.memory_space<vmem>>, %arg3: memref<8x64xf32, #tpu.memory_space<vmem>>, %arg4: memref<8x64xf32, #tpu.memory_space<vmem>>) attributes {dimension_semantics = [#tpu.dimension_semantics<parallel>], iteration_bounds = array<i64: 1>, scalar_prefetch = 0 : i64, scratch_operands = 0 : i64, tpu.core_type = #tpu.core_type<tc>, window_params = [{transform_indices = @transform_0, window_bounds = array<i64: 8, 8>}, {pipeline_mode = #tpu.pipeline_mode<synchronous>, transform_indices = @transform_1, window_bounds = array<i64: 6, 64, 64>}, {pipeline_mode = #tpu.pipeline_mode<synchronous>, transform_indices = @transform_2, window_bounds = array<i64: 8, 64>}, {transform_indices = @transform_3, window_bounds = array<i64: 8, 64>}]} {
    %c0 = arith.constant 0 : index
    %c0_0 = arith.constant 0 : index
    %0 = vector.load %arg1[%c0, %c0_0] : memref<8x8xf32, #tpu.memory_space<vmem>>, vector<8x8xf32>
    %c0_1 = arith.constant 0 : index
    %c0_2 = arith.constant 0 : index
    %c0_3 = arith.constant 0 : index
    %1 = vector.load %arg2[%c0_1, %c0_2, %c0_3] : memref<6x64x64xf32, #tpu.memory_space<vmem>>, vector<1x8x64xf32>
    %2 = vector.shape_cast %1 : vector<1x8x64xf32> to vector<8x64xf32>
    %cst = arith.constant dense<0.000000e+00> : vector<8x64xf32>
    %3 = tpu.matmul %0, %2, %cst {dimension_numbers = #tpu.dot_dimension_numbers<[1], [0], [0], [1], [0, 0, 1, 1], [], []>} : vector<8x8xf32>, vector<8x64xf32>, vector<8x64xf32> -> vector<8x64xf32>
    %c0_4 = arith.constant 0 : index
    %c0_5 = arith.constant 0 : index
    %4 = vector.load %arg3[%c0_4, %c0_5] : memref<8x64xf32, #tpu.memory_space<vmem>>, vector<1x64xf32>
    %5 = vector.broadcast %4 : vector<1x64xf32> to vector<8x64xf32>
    %6 = arith.addf %3, %5 : vector<8x64xf32>
    %cst_6 = arith.constant 0.000000e+00 : f32
    %7 = vector.broadcast %cst_6 : f32 to vector<8x64xf32>
    %8 = arith.maximumf %6, %7 : vector<8x64xf32>
    %c1 = arith.constant 1 : index
    %c0_7 = arith.constant 0 : index
    %c0_8 = arith.constant 0 : index
    %9 = vector.load %arg2[%c1, %c0_7, %c0_8] : memref<6x64x64xf32, #tpu.memory_space<vmem>>, vector<1x64x64xf32>
    %10 = vector.shape_cast %9 : vector<1x64x64xf32> to vector<64x64xf32>
    %cst_9 = arith.constant dense<0.000000e+00> : vector<8x64xf32>
    %11 = tpu.matmul %8, %10, %cst_9 {dimension_numbers = #tpu.dot_dimension_numbers<[1], [0], [0], [1], [0, 0, 1, 1], [], []>} : vector<8x64xf32>, vector<64x64xf32>, vector<8x64xf32> -> vector<8x64xf32>
    %c1_10 = arith.constant 1 : index
    %c0_11 = arith.constant 0 : index
    %12 = vector.load %arg3[%c1_10, %c0_11] : memref<8x64xf32, #tpu.memory_space<vmem>>, vector<1x64xf32>
    %13 = vector.broadcast %12 : vector<1x64xf32> to vector<8x64xf32>
    %14 = arith.addf %11, %13 : vector<8x64xf32>
    %cst_12 = arith.constant 0.000000e+00 : f32
    %15 = vector.broadcast %cst_12 : f32 to vector<8x64xf32>
    %16 = arith.maximumf %14, %15 : vector<8x64xf32>
    %c2 = arith.constant 2 : index
    %c0_13 = arith.constant 0 : index
    %c0_14 = arith.constant 0 : index
    %17 = vector.load %arg2[%c2, %c0_13, %c0_14] : memref<6x64x64xf32, #tpu.memory_space<vmem>>, vector<1x64x64xf32>
    %18 = vector.shape_cast %17 : vector<1x64x64xf32> to vector<64x64xf32>
    %cst_15 = arith.constant dense<0.000000e+00> : vector<8x64xf32>
    %19 = tpu.matmul %16, %18, %cst_15 {dimension_numbers = #tpu.dot_dimension_numbers<[1], [0], [0], [1], [0, 0, 1, 1], [], []>} : vector<8x64xf32>, vector<64x64xf32>, vector<8x64xf32> -> vector<8x64xf32>
    %c2_16 = arith.constant 2 : index
    %c0_17 = arith.constant 0 : index
    %20 = vector.load %arg3[%c2_16, %c0_17] : memref<8x64xf32, #tpu.memory_space<vmem>>, vector<1x64xf32>
    %21 = vector.broadcast %20 : vector<1x64xf32> to vector<8x64xf32>
    %22 = arith.addf %19, %21 : vector<8x64xf32>
    %cst_18 = arith.constant 0.000000e+00 : f32
    %23 = vector.broadcast %cst_18 : f32 to vector<8x64xf32>
    %24 = arith.maximumf %22, %23 : vector<8x64xf32>
    %c3 = arith.constant 3 : index
    %c0_19 = arith.constant 0 : index
    %c0_20 = arith.constant 0 : index
    %25 = vector.load %arg2[%c3, %c0_19, %c0_20] : memref<6x64x64xf32, #tpu.memory_space<vmem>>, vector<1x64x64xf32>
    %26 = vector.shape_cast %25 : vector<1x64x64xf32> to vector<64x64xf32>
    %cst_21 = arith.constant dense<0.000000e+00> : vector<8x64xf32>
    %27 = tpu.matmul %24, %26, %cst_21 {dimension_numbers = #tpu.dot_dimension_numbers<[1], [0], [0], [1], [0, 0, 1, 1], [], []>} : vector<8x64xf32>, vector<64x64xf32>, vector<8x64xf32> -> vector<8x64xf32>
    %c3_22 = arith.constant 3 : index
    %c0_23 = arith.constant 0 : index
    %28 = vector.load %arg3[%c3_22, %c0_23] : memref<8x64xf32, #tpu.memory_space<vmem>>, vector<1x64xf32>
    %29 = vector.broadcast %28 : vector<1x64xf32> to vector<8x64xf32>
    %30 = arith.addf %27, %29 : vector<8x64xf32>
    %cst_24 = arith.constant 0.000000e+00 : f32
    %31 = vector.broadcast %cst_24 : f32 to vector<8x64xf32>
    %32 = arith.maximumf %30, %31 : vector<8x64xf32>
    %c4 = arith.constant 4 : index
    %c0_25 = arith.constant 0 : index
    %c0_26 = arith.constant 0 : index
    %33 = vector.load %arg2[%c4, %c0_25, %c0_26] : memref<6x64x64xf32, #tpu.memory_space<vmem>>, vector<1x64x64xf32>
    %34 = vector.shape_cast %33 : vector<1x64x64xf32> to vector<64x64xf32>
    %cst_27 = arith.constant dense<0.000000e+00> : vector<8x64xf32>
    %35 = tpu.matmul %32, %34, %cst_27 {dimension_numbers = #tpu.dot_dimension_numbers<[1], [0], [0], [1], [0, 0, 1, 1], [], []>} : vector<8x64xf32>, vector<64x64xf32>, vector<8x64xf32> -> vector<8x64xf32>
    %c4_28 = arith.constant 4 : index
    %c0_29 = arith.constant 0 : index
    %36 = vector.load %arg3[%c4_28, %c0_29] : memref<8x64xf32, #tpu.memory_space<vmem>>, vector<1x64xf32>
    %37 = vector.broadcast %36 : vector<1x64xf32> to vector<8x64xf32>
    %38 = arith.addf %35, %37 : vector<8x64xf32>
    %cst_30 = arith.constant 0.000000e+00 : f32
    %39 = vector.broadcast %cst_30 : f32 to vector<8x64xf32>
    %40 = arith.maximumf %38, %39 : vector<8x64xf32>
    %c5 = arith.constant 5 : index
    %c0_31 = arith.constant 0 : index
    %c0_32 = arith.constant 0 : index
    %41 = vector.load %arg2[%c5, %c0_31, %c0_32] : memref<6x64x64xf32, #tpu.memory_space<vmem>>, vector<1x64x64xf32>
    %42 = vector.shape_cast %41 : vector<1x64x64xf32> to vector<64x64xf32>
    %cst_33 = arith.constant dense<0.000000e+00> : vector<8x64xf32>
    %43 = tpu.matmul %40, %42, %cst_33 {dimension_numbers = #tpu.dot_dimension_numbers<[1], [0], [0], [1], [0, 0, 1, 1], [], []>} : vector<8x64xf32>, vector<64x64xf32>, vector<8x64xf32> -> vector<8x64xf32>
    %c5_34 = arith.constant 5 : index
    %c0_35 = arith.constant 0 : index
    %44 = vector.load %arg3[%c5_34, %c0_35] : memref<8x64xf32, #tpu.memory_space<vmem>>, vector<1x64xf32>
    %45 = vector.broadcast %44 : vector<1x64xf32> to vector<8x64xf32>
    %46 = arith.addf %43, %45 : vector<8x64xf32>
    %c0_36 = arith.constant 0 : index
    %c0_37 = arith.constant 0 : index
    %47 = vector.load %arg4[%c0_36, %c0_37] : memref<8x64xf32, #tpu.memory_space<vmem>>, vector<8x64xf32>
    tpu.vector_store %arg4[%c0_36, %c0_37], %46 {strides = array<i32>} : memref<8x64xf32, #tpu.memory_space<vmem>>, vector<8x64xf32>,
    return
  }
  func.func @transform_0(%arg0: i32) -> (i32, i32) {
    %c0_i32 = arith.constant 0 : i32
    %c0_i32_0 = arith.constant 0 : i32
    return %arg0, %c0_i32 : i32, i32
  }
  func.func @transform_1(%arg0: i32) -> (i32, i32, i32) {
    %c0_i32 = arith.constant 0 : i32
    %c0_i32_0 = arith.constant 0 : i32
    %c0_i32_1 = arith.constant 0 : i32
    %c0_i32_2 = arith.constant 0 : i32
    return %c0_i32, %c0_i32_0, %c0_i32_1 : i32, i32, i32
  }
  func.func @transform_2(%arg0: i32) -> (i32, i32) {
    %c0_i32 = arith.constant 0 : i32
    %c0_i32_0 = arith.constant 0 : i32
    %c0_i32_1 = arith.constant 0 : i32
    return %c0_i32, %c0_i32_0 : i32, i32
  }
  func.func @transform_3(%arg0: i32) -> (i32, i32) {
    %c0_i32 = arith.constant 0 : i32
    %c0_i32_0 = arith.constant 0 : i32
    return %arg0, %c0_i32 : i32, i32
  }
}

</mosaic_0001>

<bundles_post_ra>
// kernel: tpu_custom_call.1
= control target key start
LH: loop header
LB: loop body
LE: loop exit
PB: predicated region body
PF: predicated region fallthrough
CT: control target
= control target key end

     0   :  { %8 = vsyncpa [#allocation3], 0  ;;  %s1029_s0 = inlined_call_operand.hbm [shape: f32[8,8], index: 0, kind: input, shape index: {}]   ;;  %s1030_s1 = inlined_call_operand.hbm [shape: f32[6,64,64], index: 1, kind: input, shape index: {}]   ;;  %s1031_s2 = inlined_call_operand.hbm [shape: f32[8,64], index: 2, kind: input, shape index: {}]   ;;  %s1032_s3 = inlined_call_operand.hbm [shape: f32[8,64], index: 3, kind: output, shape index: {}]  }
   0x1   :  { %9 = vsyncpa [#allocation6], 0 }
   0x2   :  { %10 = vsyncpa [#allocation4], 0  ;;  %s913_s12 = smov [#allocation5]   ;;  %s819_s16 = scalar_lea.hbm %s1030_s1, 6144 }
   0x3   :  { %s26_s13 = sshll.u32 %s913_s12, 4  ;;  %p820_p0 = scmp.ne.s32.totalorder %s1030_s1, %s819_s16  ;;  %s27_s13 = int_to_ptr.vmem [resolvable:$true] %s26_s13 }
   0x4   :  { %p823_p1 = scmp.lt.u32.totalorder %s819_s16, %s1030_s1 }
   0x6   :  { %p825_p2 = pnand %p823_p1, %p820_p0 }
   0x8   :  { %828 = shalt.err (!%p825_p2)
}
   0x9   :  { %s829_s21 = scalar_lea.vmem %s27_s13, 6144  ;;  %p834_p4 = scmp.lt.s32.totalorder %s27_s13, %s27_s13 }
   0xa   :  { %p830_p3 = scmp.ne.s32.totalorder %s27_s13, %s829_s21  ;;  %p835_p5 = scmp.lt.s32.totalorder %s829_s21, %s829_s21 }
   0xc   :  { %p836_p6 = por %p835_p5, %p834_p4 }
   0xe   :  { %p837_p7 = pnand %p836_p6, %p830_p3 }
  0x10   :  { %840 = shalt.err (!%p837_p7)
}
  0x11   :  { %s914_s22 = smov 128   ;;  %s915_s23 = smov 8  }
  0x12   :  { %32 = dma.hbm_to_vmem [thread:$0]  %s1030_s1, 6144, %s27_s13, [#allocation6], %s914_s22, %s914_s22, %s915_s23  }
  0x13   :  { %s916_s26 = smov [#allocation2]   ;;  %s917_s28 = smov [#allocation7]  }
  0x14   :  { %s17_s27 = sshll.u32 %s916_s26, 4  ;;  %s39_s29 = sshll.u32 %s917_s28, 4  ;;  %s18_s27 = int_to_ptr.vmem [resolvable:$true] %s17_s27  ;;  %s40_s29 = int_to_ptr.vmem [resolvable:$true] %s39_s29 }
  0x15   :  { %s841_s5 = scalar_lea.hbm %s1029_s0, 128 }
  0x16   :  { %p842_p8 = scmp.ne.s32.totalorder %s1029_s0, %s841_s5  ;;  %p845_p9 = scmp.lt.u32.totalorder %s841_s5, %s1029_s0 }
  0x18   :  { %p847_p10 = pnand %p845_p9, %p842_p8 }
  0x1a   :  { %850 = shalt.err (!%p847_p10)
}
  0x1b   :  { %s851_s1 = scalar_lea.vmem %s18_s27, 128  ;;  %p856_p12 = scmp.lt.s32.totalorder %s18_s27, %s18_s27 }
  0x1c   :  { %p852_p11 = scmp.ne.s32.totalorder %s18_s27, %s851_s1  ;;  %p857_p13 = scmp.lt.s32.totalorder %s851_s1, %s851_s1 }
  0x1e   :  { %p858_p0 = por %p857_p13, %p856_p12 }
  0x20   :  { %p859_p1 = pnand %p858_p0, %p852_p11 }
  0x22   :  { %862 = shalt.err (!%p859_p1)
}
  0x23   :  { %20 = dma.hbm_to_vmem [thread:$0]  %s1029_s0, 128, %s18_s27, [#allocation3]  }
  0x24   :  { %s863_s14 = scalar_lea.hbm %s1031_s2, 128 }
  0x25   :  { %p864_p2 = scmp.ne.s32.totalorder %s1031_s2, %s863_s14  ;;  %p867_p3 = scmp.lt.u32.totalorder %s863_s14, %s1031_s2 }
  0x27   :  { %p869_p4 = pnand %p867_p3, %p864_p2 }
  0x29   :  { %872 = shalt.err (!%p869_p4)
}
  0x2a   :  { %s873_s19 = scalar_lea.vmem %s40_s29, 128  ;;  %p878_p6 = scmp.lt.s32.totalorder %s40_s29, %s40_s29 }
  0x2b   :  { %p874_p5 = scmp.ne.s32.totalorder %s40_s29, %s873_s19  ;;  %p879_p7 = scmp.lt.s32.totalorder %s873_s19, %s873_s19 }
  0x2d   :  { %p880_p8 = por %p879_p7, %p878_p6 }
  0x2f   :  { %p881_p9 = pnand %p880_p8, %p874_p5 }
  0x31   :  { %884 = shalt.err (!%p881_p9)
}
  0x32   :  { %42 = dma.hbm_to_vmem [thread:$0]  %s1031_s2, 128, %s40_s29, [#allocation6]  }
  0x33   :  { %907 = dma.done.wait [#allocation3], 128  }
  0x34   :  { %908 = vsyncadd [#allocation3], 4294967168 }
  0x35   :  { %909 = dma.done.wait [#allocation6], 6272  }
  0x36   :  { %910 = vsyncadd [#allocation6], 4294961024  ;;  %v918_v0 = vmov 0.0   ;;  %vm919_vm0 = vmmov 0   ;;  %v920_v1 = vmov 0.0|0.0   ;;  %vm59_vm1 = vcmask 64512  }
  0x37   :  { %650 = vmatprep.subr.mxu0 %v918_v0  ;;  %652 = vmatprep.mubr.msk.f32.mxu0 %vm919_vm0, %v918_v0  ;;  %v53_v2 = vld [vmem:[#allocation5] sm:$0xff]  ;;  %v52_v3 = vld [vmem:[#allocation2] sm:$0xff]  ;;  %v136_v5 = vld [vmem:[#allocation5 + $0x48] sm:$0xff]  ;;  %vm148_vm2 = vcmask 523264   ;;  %s921_s2 = smov [#allocation8]  }
  0x38   :  { %750 = vmatprep.subr.bf16.mxu1 %v920_v1  ;;  %671 = vmatprep.mubr.msk.f32.mxu1 %vm919_vm0, %v918_v0  ;;  %v135_v4 = vld [vmem:[#allocation5 + $0x40] sm:$0xff]  ;;  %v137_v6 = vld [vmem:[#allocation5 + $0x50] sm:$0xff]  ;;  %v138_v7 = vld [vmem:[#allocation5 + $0x58] sm:$0xff]  ;;  %s581_s21 = sshll.u32 %s921_s2, 4  ;;  %s582_s21 = int_to_ptr.vmem [resolvable:$true] %s581_s21 }
  0x39   :  { %651 = vmatpush3.msra.mxu0 %v53_v2  ;;  %v751_v8 = vpack.c.bf16 %v136_v5, %v135_v4  ;;  %v754_v9 = vpack.c.bf16 %v138_v7, %v137_v6  ;;  %v139_v10 = vld [vmem:[#allocation5 + $0x60] sm:$0xff]  ;;  %v140_v11 = vld [vmem:[#allocation5 + $0x68] sm:$0xff]  ;;  %v141_v13 = vld [vmem:[#allocation5 + $0x70] sm:$0xff]  ;;  %s885_s22 = scalar_lea.vmem %s582_s21, 128  ;;  %p890_p11 = scmp.lt.s32.totalorder %s582_s21, %s582_s21 }
  0x3a   :  { %653 = vmatmul.mubr.msk.f32.vlgmr.msra.gmra.mrb[0].mxu0 %vm59_vm1, %v52_v3  ;;  %762 = vmatprep.subr.bf16.mxu0 %v920_v1  ;;  %v757_v12 = vpack.c.bf16 %v140_v11, %v139_v10  ;;  %v142_v14 = vld [vmem:[#allocation5 + $0x78] sm:$0xff]  ;;  %v224_v16 = vld [vmem:[#allocation5 + $0x80] sm:$0xff]  ;;  %v225_v17 = vld [vmem:[#allocation5 + $0x88] sm:$0xff]  ;;  %p886_p10 = scmp.ne.s32.totalorder %s582_s21, %s885_s22  ;;  %p891_p12 = scmp.lt.s32.totalorder %s885_s22, %s885_s22 }
  0x3b   :  { %690 = vmatprep.mubr.msk.f32.mxu0 %vm919_vm0, %v918_v0  ;;  %752 = vmatpush3.bf16.msra.mxu1 %v751_v8  ;;  %v760_v15 = vpack.c.bf16 %v142_v14, %v141_v13  ;;  %v226_v18 = vld [vmem:[#allocation5 + $0x90] sm:$0xff]  ;;  %v763_v19 = vpack.c.bf16 %v225_v17, %v224_v16  ;;  %v227_v20 = vld [vmem:[#allocation5 + $0x98] sm:$0xff]  ;;  %v228_v22 = vld [vmem:[#allocation5 + $0xa0] sm:$0xff] }
  0x3c   :  { %753 = vmatprep.subr.bf16.mxu1 %v920_v1  ;;  %v766_v21 = vpack.c.bf16 %v227_v20, %v226_v18  ;;  %v229_v23 = vld [vmem:[#allocation5 + $0xa8] sm:$0xff]  ;;  %v591_v25 = vld [vmem:[#allocation7] ss:$0 sm:$0xff]  ;;  %v230_v30 = vld [vmem:[#allocation5 + $0xb0] sm:$0xff]  ;;  %p892_p13 = por %p891_p12, %p890_p11 }
  0x3d   :  { %764 = vmatpush3.bf16.msra.mxu0 %v763_v19  ;;  %v769_v24 = vpack.c.bf16 %v229_v23, %v228_v22  ;;  %v231_v31 = vld [vmem:[#allocation5 + $0xb8] sm:$0xff]  ;;  %v312_v33 = vld [vmem:[#allocation5 + $0xc0] sm:$0xff]  ;;  %v313_v34 = vld [vmem:[#allocation5 + $0xc8] sm:$0xff] }
  0x3e   :  { %765 = vmatprep.subr.bf16.mxu0 %v920_v1  ;;  %v772_v32 = vpack.c.bf16 %v231_v31, %v230_v30  ;;  %v314_v35 = vld [vmem:[#allocation5 + $0xd0] sm:$0xff]  ;;  %v775_v36 = vpack.c.bf16 %v313_v34, %v312_v33  ;;  %v315_v37 = vld [vmem:[#allocation5 + $0xd8] sm:$0xff]  ;;  %v316_v39 = vld [vmem:[#allocation5 + $0xe0] sm:$0xff]  ;;  %p893_p0 = pnand %p892_p13, %p886_p10 }
  0x3f   :  { %755 = vmatpush3.bf16.msra.mxu1 %v754_v9  ;;  %v778_v38 = vpack.c.bf16 %v315_v37, %v314_v35  ;;  %v317_v40 = vld [vmem:[#allocation5 + $0xe8] sm:$0xff]  ;;  %v593_v42 = vld [vmem:[#allocation7 + $0x1] ss:$0 sm:$0xff]  ;;  %v318_v47 = vld [vmem:[#allocation5 + $0xf0] sm:$0xff] }
  0x40   :  { %756 = vmatprep.subr.bf16.mxu1 %v920_v1  ;;  %v781_v41 = vpack.c.bf16 %v317_v40, %v316_v39  ;;  %v319_v48 = vld [vmem:[#allocation5 + $0xf8] sm:$0xff]  ;;  %v400_v50 = vld [vmem:[#allocation5 + $0x100] sm:$0xff]  ;;  %v401_v51 = vld [vmem:[#allocation5 + $0x108] sm:$0xff] }
  0x41   :  { %767 = vmatpush3.bf16.msra.mxu0 %v766_v21  ;;  %v784_v49 = vpack.c.bf16 %v319_v48, %v318_v47  ;;  %v402_v52 = vld [vmem:[#allocation5 + $0x110] sm:$0xff]  ;;  %v787_v53 = vpack.c.bf16 %v401_v51, %v400_v50  ;;  %v403_v54 = vld [vmem:[#allocation5 + $0x118] sm:$0xff]  ;;  %v404_v56 = vld [vmem:[#allocation5 + $0x120] sm:$0xff] }
  0x42   :  { %768 = vmatprep.subr.bf16.mxu0 %v920_v1  ;;  %v790_v55 = vpack.c.bf16 %v403_v54, %v402_v52  ;;  %v405_v57 = vld [vmem:[#allocation5 + $0x128] sm:$0xff]  ;;  %v595_v59 = vld [vmem:[#allocation7 + $0x2] ss:$0 sm:$0xff]  ;;  %v406_v2 = vld [vmem:[#allocation5 + $0x130] sm:$0xff] }
  0x43   :  { %758 = vmatpush3.bf16.msra.mxu1 %v757_v12  ;;  %v793_v58 = vpack.c.bf16 %v405_v57, %v404_v56  ;;  %v407_v3 = vld [vmem:[#allocation5 + $0x138] sm:$0xff]  ;;  %v488_v5 = vld [vmem:[#allocation5 + $0x140] sm:$0xff]  ;;  %v489_v6 = vld [vmem:[#allocation5 + $0x148] sm:$0xff] }
  0x44   :  { %759 = vmatprep.subr.bf16.mxu1 %v920_v1  ;;  %v796_v4 = vpack.c.bf16 %v407_v3, %v406_v2  ;;  %v490_v7 = vld [vmem:[#allocation5 + $0x150] sm:$0xff]  ;;  %v799_v8 = vpack.c.bf16 %v489_v6, %v488_v5  ;;  %v491_v9 = vld [vmem:[#allocation5 + $0x158] sm:$0xff]  ;;  %v492_v11 = vld [vmem:[#allocation5 + $0x160] sm:$0xff] }
  0x45   :  { %770 = vmatpush3.bf16.msra.mxu0 %v769_v24  ;;  %v802_v10 = vpack.c.bf16 %v491_v9, %v490_v7  ;;  %v493_v12 = vld [vmem:[#allocation5 + $0x168] sm:$0xff]  ;;  %v494_v18 = vld [vmem:[#allocation5 + $0x170] sm:$0xff]  ;;  %v495_v19 = vld [vmem:[#allocation5 + $0x178] sm:$0xff] }
  0x46   :  { %771 = vmatprep.subr.bf16.mxu0 %v920_v1  ;;  %v805_v13 = vpack.c.bf16 %v493_v12, %v492_v11  ;;  %v808_v20 = vpack.c.bf16 %v495_v19, %v494_v18  ;;  %v599_v21 = vld [vmem:[#allocation7 + $0x4] ss:$0 sm:$0xff] }
  0x47   :  { %761 = vmatpush3.bf16.msra.mxu1 %v760_v15 }
  0x48   :  { %774 = vmatprep.subr.bf16.mxu1 %v920_v1 }
  0x49   :  { %773 = vmatpush3.bf16.msra.mxu0 %v772_v32 }
  0x4a   :  { %786 = vmatprep.subr.bf16.mxu0 %v920_v1 }
 0x10d   :  { %v129_v26 = vpop.f32.mrb[0].mxu0 }
 0x10e   :  { %v130_v27 = vadd.f32 %v591_v25, %v129_v26  ;;  %v654_v28 = vpop.f32.mrb[1].mxu0  ;;  %v601_v26 = vld [vmem:[#allocation7 + $0x5] ss:$0 sm:$0xff] }
 0x110   :  { %v133_v29 = vmax.f32 %v130_v27, 0.0 }
 0x112   :  { %672 = vmatmul.mubr.msk.f32.vlgmr.msra.gmra.mrb[0].mxu1 %vm148_vm2, %v133_v29 }
 0x113   :  { %709 = vmatprep.mubr.msk.f32.mxu1 %vm919_vm0, %v918_v0  ;;  %776 = vmatpush3.bf16.msra.mxu1 %v775_v36 }
 0x114   :  { %777 = vmatprep.subr.bf16.mxu1 %v920_v1 }
 0x117   :  { %779 = vmatpush3.bf16.msra.mxu1 %v778_v38 }
 0x118   :  { %780 = vmatprep.subr.bf16.mxu1 %v920_v1 }
 0x11b   :  { %782 = vmatpush3.bf16.msra.mxu1 %v781_v41 }
 0x11c   :  { %783 = vmatprep.subr.bf16.mxu1 %v920_v1 }
 0x11f   :  { %785 = vmatpush3.bf16.msra.mxu1 %v784_v49 }
 0x120   :  { %798 = vmatprep.subr.bf16.mxu1 %v920_v1 }
 0x1e5   :  { %v218_v43 = vpop.f32.mrb[0].mxu1 }
 0x1e6   :  { %v219_v44 = vadd.f32 %v593_v42, %v218_v43  ;;  %v673_v45 = vpop.f32.mrb[1].mxu1 }
 0x1e8   :  { %v222_v46 = vmax.f32 %v219_v44, 0.0 }
 0x1ea   :  { %691 = vmatmul.mubr.msk.f32.vlgmr.msra.gmra.mrb[2].mxu0 %vm148_vm2, %v222_v46 }
 0x1eb   :  { %728 = vmatprep.mubr.msk.f32.mxu0 %vm919_vm0, %v918_v0  ;;  %788 = vmatpush3.bf16.msra.mxu0 %v787_v53 }
 0x1ec   :  { %789 = vmatprep.subr.bf16.mxu0 %v920_v1 }
 0x1ef   :  { %791 = vmatpush3.bf16.msra.mxu0 %v790_v55 }
 0x1f0   :  { %792 = vmatprep.subr.bf16.mxu0 %v920_v1 }
 0x1f3   :  { %794 = vmatpush3.bf16.msra.mxu0 %v793_v58 }
 0x1f4   :  { %795 = vmatprep.subr.bf16.mxu0 %v920_v1 }
 0x1f7   :  { %797 = vmatpush3.bf16.msra.mxu0 %v796_v4 }
 0x2bd   :  { %v306_v60 = vpop.f32.mrb[2].mxu0 }
 0x2be   :  { %v307_v61 = vadd.f32 %v595_v59, %v306_v60  ;;  %v692_v62 = vpop.f32.mrb[3].mxu0 }
 0x2c0   :  { %v310_v63 = vmax.f32 %v307_v61, 0.0 }
 0x2c2   :  { %710 = vmatmul.mubr.msk.f32.vlgmr.msra.gmra.mrb[2].mxu1 %vm148_vm2, %v310_v63 }
 0x2c3   :  { %747 = vmatprep.mubr.msk.f32.mxu1 %vm919_vm0, %v918_v0  ;;  %800 = vmatpush3.bf16.msra.mxu1 %v799_v8  ;;  %v597_v0 = vld [vmem:[#allocation7 + $0x3] ss:$0 sm:$0xff] }
 0x2c4   :  { %801 = vmatprep.subr.bf16.mxu1 %v920_v1 }
 0x2c7   :  { %803 = vmatpush3.bf16.msra.mxu1 %v802_v10 }
 0x2c8   :  { %804 = vmatprep.subr.bf16.mxu1 %v920_v1 }
 0x2cb   :  { %806 = vmatpush3.bf16.msra.mxu1 %v805_v13 }
 0x2cc   :  { %807 = vmatprep.subr.bf16.mxu1 %v920_v1 }
 0x2cf   :  { %809 = vmatpush3.bf16.msra.mxu1 %v808_v20 }
 0x395   :  { %v394_v14 = vpop.f32.mrb[2].mxu1 }
 0x396   :  { %v395_v15 = vadd.f32 %v597_v0, %v394_v14  ;;  %v711_v16 = vpop.f32.mrb[3].mxu1 }
 0x398   :  { %v398_v17 = vmax.f32 %v395_v15, 0.0 }
 0x39a   :  { %729 = vmatmul.mubr.msk.f32.vlgmr.msra.gmra.mrb[4].mxu0 %vm148_vm2, %v398_v17 }
 0x46d   :  { %v482_v22 = vpop.f32.mrb[4].mxu0 }
 0x46e   :  { %v483_v23 = vadd.f32 %v599_v21, %v482_v22  ;;  %v730_v24 = vpop.f32.mrb[5].mxu0 }
 0x470   :  { %v486_v25 = vmax.f32 %v483_v23, 0.0 }
 0x472   :  { %748 = vmatmul.mubr.msk.f32.vlgmr.msra.gmra.mrb[4].mxu1 %vm148_vm2, %v486_v25 }
 0x545   :  { %v570_v1 = vpop.f32.mrb[4].mxu1 }
 0x546   :  { %v571_v27 = vadd.f32 %v601_v26, %v570_v1  ;;  %v749_v28 = vpop.f32.mrb[5].mxu1 }
 0x548   :  { %574 = vst.msk [vmem:[#allocation8] sm:$0xff] %vm148_vm2, %v571_v27 }
 0x549   :  { %896 = shalt.err (!%p893_p0)
}
 0x54a   :  { %s897_s25 = scalar_lea.hbm %s1032_s3, 128 }
 0x54b   :  { %p898_p1 = scmp.ne.s32.totalorder %s1032_s3, %s897_s25  ;;  %p901_p2 = scmp.lt.u32.totalorder %s897_s25, %s1032_s3 }
 0x54d   :  { %p903_p3 = pnand %p901_p2, %p898_p1 }
 0x54f   :  { %906 = shalt.err (!%p903_p3)
}
 0x550   :  { %584 = dma.vmem_to_hbm [thread:$0]  %s582_s21, 128, %s1032_s3, [#allocation4]  }
 0x551   :  { %911 = dma.done.wait [#allocation4], 128  }
 0x552   :  { %912 = vsyncadd [#allocation4], 4294967168 }
 0x553   :  { %588 = vsyncpa [#allocation3], 1 }
 0x554   :  { %589 = vsyncpa [#allocation6], 1 }
 0x555   :  { %590 = vsyncpa [#allocation4], 1 }

</bundles_post_ra>
